<compile_context>
chip_gen: v5e
topology: v5e:2x2
jax: 0.10.0
libtpu: 0.0.40
codegen_flags: <defaults>
</compile_context>

<pallas_src>
import jax
import jax.numpy as jnp
from jax.experimental import pallas as pl
from jax.experimental.pallas import tpu as pltpu

LANES = 128
TARGET_BLOCK_BYTES = 4 * 1024 * 1024    # ~4 MiB per grid-step block
SPLIT_THRESHOLD_BYTES = 512 * 1024      # above this, use >=2 grid steps (v7x megacore)
MIN_PALLAS_BYTES = 64 * 1024            # below this, fused XLA beats kernel dispatch
_SUBLANE_MULT = {4: 8, 2: 16, 1: 32}    # (sublane, 128) tiling multiple per itemsize


def _poly(x, t1, t2):
    # -t1*x^2 + t2*x  ==  x * (t2 - t1*x)
    return x * (t2 - t1 * x)


def toy_kernel(theta_ref, x_ref, o_ref):
    # theta_ref: SMEM (2,) f32 scalars [theta1, theta2].
    x = x_ref[...]
    # Compute in the I/O dtype (bf16-native VALUs on v6e/v7x; kernel is
    # memory-bound so any internal f32 promotion on v5e is irrelevant).
    t1 = theta_ref[0].astype(x.dtype)
    t2 = theta_ref[1].astype(x.dtype)
    o_ref[...] = _poly(x, t1, t2).astype(o_ref.dtype)


def _round_up(a, b):
    return (a + b - 1) // b * b


def _choose_tile_rows(rows, itemsize):
    sub = _SUBLANE_MULT.get(itemsize, 8)
    row_bytes = LANES * itemsize
    if rows * row_bytes <= SPLIT_THRESHOLD_BYTES:
        # One block covering the whole slab (block == full extent is always legal).
        return rows
    # Cap block bytes so in+out double-buffered (4x block) stays inside scoped
    # VMEM on every generation (16 MiB live vs. v7x's 32 MiB default scoped).
    cap_rows = max(sub, (TARGET_BLOCK_BYTES // row_bytes) // sub * sub)
    # At least 2 grid steps so dimension_semantics=("parallel",) can shard the
    # sweep across v7x's two TensorCores.
    return min(cap_rows, _round_up(pl.cdiv(rows, 2), sub))


def _vmem_limit_bytes():
    try:
        cap = pltpu.get_tpu_info().vmem_capacity_bytes
    except Exception:  # hardware query unavailable (e.g. interpret mode)
        cap = 64 * 1024 * 1024
    return int(min(48 * 1024 * 1024, max(16 * 1024 * 1024, cap // 2)))


def _pallas_slab(x2d, theta):
    rows, lanes = x2d.shape
    itemsize = jnp.dtype(x2d.dtype).itemsize
    tile_rows = _choose_tile_rows(rows, itemsize)
    grid = (pl.cdiv(rows, tile_rows),)

    params = {"dimension_semantics": ("parallel",)}
    footprint = 4 * tile_rows * lanes * itemsize  # in + out, double-buffered
    if footprint > 12 * 1024 * 1024:
        # v5e's default scoped VMEM is only 16 MiB of 128 MiB; raise it so the
        # big-block tiling is not silently shrunk or rejected.
        params["vmem_limit_bytes"] = _vmem_limit_bytes()

    return pl.pallas_call(
        toy_kernel,
        out_shape=jax.ShapeDtypeStruct((rows, lanes), x2d.dtype),
        grid_spec=pltpu.PrefetchScalarGridSpec(
            num_scalar_prefetch=0,
            grid=grid,
            in_specs=[
                pl.BlockSpec(memory_space=pltpu.SMEM),               # theta scalars
                pl.BlockSpec((tile_rows, lanes), lambda i: (i, 0)),  # x slab
            ],
            out_specs=pl.BlockSpec((tile_rows, lanes), lambda i: (i, 0)),
        ),
        compiler_params=pltpu.CompilerParams(**params),
        # NOTE: no input_output_aliases — x is typically still live in the
        # caller, so an alias would force XLA into a defensive full copy.
    )(theta, x2d)


def toy_model_forward(x, theta1, theta2, *, force_pallas=False):
    """Elementwise y = -theta1*x**2 + theta2*x for any shape/dtype array x."""
    orig_shape = x.shape
    total = x.size
    itemsize = jnp.dtype(x.dtype).itemsize
    t1 = jnp.asarray(theta1, x.dtype)
    t2 = jnp.asarray(theta2, x.dtype)

    # Tiny-input fast path: at a few KiB the pallas_call is pure dispatch
    # overhead; a fused XLA elementwise matches or beats it.
    if not force_pallas and total * itemsize < MIN_PALLAS_BYTES:
        return _poly(x, t1, t2)

    theta = jnp.stack([jnp.asarray(theta1), jnp.asarray(theta2)]).astype(jnp.float32)
    flat = x.reshape(-1)
    rows = total // LANES
    tail = total - rows * LANES

    if tail == 0:
        # No padding / slicing passes: pure reshape to a lane-dense slab.
        out = _pallas_slab(flat.reshape(rows, LANES), theta)
        return out.reshape(orig_shape)

    if rows == 0:  # fewer than 128 elements total
        return _poly(x, t1, t2)

    # Ragged size: kernel handles the 128-aligned prefix; the <=127-element tail
    # is plain jnp (cheaper than a pad + slice round trip over the whole array).
    head = _pallas_slab(flat[: rows * LANES].reshape(rows, LANES), theta).reshape(-1)
    tail_out = _poly(flat[rows * LANES:], t1, t2)
    return jnp.concatenate([head, tail_out]).reshape(orig_shape)


if __name__ == "__main__":
    key = jax.random.PRNGKey(0)
    k1, k2, k3 = jax.random.split(key, 3)

    # Deterministic parameter init matching nn.Parameter(torch.tensor(0.5)), (-0.5).
    theta1 = jnp.float32(0.5)
    theta2 = jnp.float32(-0.5)

    def ref(x):
        return -theta1 * x ** 2 + theta2 * x

    # Demo-sized NCHW input (2048 elements -> one 16x128 slab). Force the
    # Pallas path so the kernel itself is exercised on TPU.
    x = jax.random.normal(k1, (2, 4, 16, 16), dtype=jnp.float32)
    y = jax.block_until_ready(toy_model_forward(x, theta1, theta2, force_pallas=True))
    assert y.shape == x.shape and y.dtype == x.dtype
    assert jnp.allclose(y, ref(x), atol=1e-6, rtol=1e-6)

    # Larger multi-block case (8192x128 slab -> two "parallel" grid steps).
    xb = jax.random.normal(k2, (1024, 1024), dtype=jnp.float32)
    yb = jax.block_until_ready(toy_model_forward(xb, theta1, theta2))
    assert jnp.allclose(yb, ref(xb), atol=1e-5, rtol=1e-5)

    # Ragged size (not a multiple of 128): aligned prefix in-kernel, jnp tail.
    xr = jax.random.normal(k3, (3, 5, 33, 37), dtype=jnp.float32)
    yr = jax.block_until_ready(toy_model_forward(xr, theta1, theta2))
    assert yr.shape == xr.shape
    assert jnp.allclose(yr, ref(xr), atol=1e-6, rtol=1e-6)

    print("KERNEL_OK")
</pallas_src>

<mosaic_0001>
module attributes {stable_mosaic.version = 11 : i64} {
  func.func @toy_kernel(%arg0: i32, %arg1: memref<2xf32, #tpu.memory_space<smem>>, %arg2: memref<16x128xf32, #tpu.memory_space<vmem>>, %arg3: memref<16x128xf32, #tpu.memory_space<vmem>>) attributes {dimension_semantics = [#tpu.dimension_semantics<parallel>], iteration_bounds = array<i64: 1>, scalar_prefetch = 0 : i64, scratch_operands = 0 : i64, tpu.core_type = #tpu.core_type<tc>, window_params = [{transform_indices = @transform_0, window_bounds = array<i64: 2>}, {transform_indices = @transform_1, window_bounds = array<i64: 16, 128>}, {transform_indices = @transform_2, window_bounds = array<i64: 16, 128>}]} {
    %c0 = arith.constant 0 : index
    %c0_0 = arith.constant 0 : index
    %0 = vector.load %arg2[%c0, %c0_0] : memref<16x128xf32, #tpu.memory_space<vmem>>, vector<16x128xf32>
    %c0_1 = arith.constant 0 : index
    %1 = memref.load %arg1[%c0_1] : memref<2xf32, #tpu.memory_space<smem>>
    %c1 = arith.constant 1 : index
    %2 = memref.load %arg1[%c1] : memref<2xf32, #tpu.memory_space<smem>>
    %3 = vector.broadcast %1 : f32 to vector<16x128xf32>
    %4 = arith.mulf %3, %0 : vector<16x128xf32>
    %5 = vector.broadcast %2 : f32 to vector<16x128xf32>
    %6 = arith.subf %5, %4 : vector<16x128xf32>
    %7 = arith.mulf %0, %6 : vector<16x128xf32>
    %c0_2 = arith.constant 0 : index
    %c0_3 = arith.constant 0 : index
    %8 = vector.load %arg3[%c0_2, %c0_3] : memref<16x128xf32, #tpu.memory_space<vmem>>, vector<16x128xf32>
    tpu.vector_store %arg3[%c0_2, %c0_3], %7 {strides = array<i32>} : memref<16x128xf32, #tpu.memory_space<vmem>>, vector<16x128xf32>,
    return
  }
  func.func @transform_0(%arg0: i32) -> i32 {
    %c0_i32 = arith.constant 0 : i32
    %c0_i32_0 = arith.constant 0 : i32
    return %c0_i32 : i32
  }
  func.func @transform_1(%arg0: i32) -> (i32, i32) {
    %c0_i32 = arith.constant 0 : i32
    %c0_i32_0 = arith.constant 0 : i32
    return %arg0, %c0_i32 : i32, i32
  }
  func.func @transform_2(%arg0: i32) -> (i32, i32) {
    %c0_i32 = arith.constant 0 : i32
    %c0_i32_0 = arith.constant 0 : i32
    return %arg0, %c0_i32 : i32, i32
  }
}

</mosaic_0001>

<bundles_post_ra>
// kernel: tpu_custom_call.1
= control target key start
LH: loop header
LB: loop body
LE: loop exit
PB: predicated region body
PF: predicated region fallthrough
CT: control target
= control target key end

     0   :  { %7 = vsyncpa [#allocation5], 0  ;;  %s182_s0 = inlined_call_operand.hbm [shape: f32[2], index: 0, kind: input, shape index: {}]   ;;  %s183_s1 = inlined_call_operand.hbm [shape: f32[16,128], index: 1, kind: input, shape index: {}]   ;;  %s184_s2 = inlined_call_operand.hbm [shape: f32[16,128], index: 2, kind: output, shape index: {}]  }
   0x1   :  { %8 = vsyncpa [#allocation3], 0 }
   0x2   :  { %9 = vsyncpa [#allocation4], 0  ;;  %s15_s11 = sshll.u32 %s182_s0, 4  ;;  %s23_s14 = sshll.u32 %s183_s1, 4  ;;  %s16_s11 = int_to_ptr.hbm [resolvable:$true] %s15_s11  ;;  %s24_s14 = int_to_ptr.hbm [resolvable:$true] %s23_s14 }
   0x3   :  { %s147_s15 = smov [#allocation2]   ;;  %s148_s16 = smov [#allocation6]  }
   0x4   :  { %18 = dma.hbm_to_smem %s16_s11, 16, %s147_s15, [#allocation5]  }
   0x5   :  { %s25_s17 = sshll.u32 %s148_s16, 4  ;;  %s149_s18 = smov 128   ;;  %s26_s17 = int_to_ptr.vmem [resolvable:$true] %s25_s17 }
   0x6   :  { %s150_s19 = smov 8  }
   0x7   :  { %31 = dma.hbm_to_vmem [thread:$0]  %s24_s14, 256, %s26_s17, [#allocation3], %s149_s18, %s149_s18, %s150_s19  }
   0x8   :  { %141 = dma.done.wait [#allocation5], 16  }
   0x9   :  { %142 = vsyncadd [#allocation5], 4294967280 }
   0xa   :  { %143 = dma.done.wait [#allocation3], 256  }
   0xb   :  { %144 = vsyncadd [#allocation3], 4294967040 }
   0xc   :  { %40 = sfence }
   0xd   :  { %s43_s0 = sld [smem:[#allocation2]]  ;;  %v41_v0 = vld [vmem:[#allocation6] sm:$0xff]  ;;  %v42_v1 = vld [vmem:[#allocation6 + $0x8] sm:$0xff]  ;;  %s151_s1 = smov [#allocation7]  }
   0xe   :  { %s75_s20 = sld [smem:[#allocation2 + $0x1]]  ;;  %s59_s21 = sshll.u32 %s151_s1, 4  ;;  %s60_s21 = int_to_ptr.vmem [resolvable:$true] %s59_s21 }
   0xf   :  { %s61_s24 = sshll.u32 %s184_s2, 4  ;;  %s62_s24 = int_to_ptr.hbm [resolvable:$true] %s61_s24 }
  0x13   :  { %v45_v2 = vstv %s43_s0 }
  0x14   :  { %v46_v3 = vmul.f32 %v45_v2, %v41_v0  ;;  %v48_v4 = vstv %s75_s20  ;;  %v47_v5 = vmul.f32 %v45_v2, %v42_v1 }
  0x16   :  { %v49_v6 = vsub.f32 %v48_v4, %v46_v3  ;;  %v50_v7 = vsub.f32 %v48_v4, %v47_v5 }
  0x18   :  { %v51_v8 = vmul.f32 %v49_v6, %v41_v0  ;;  %v52_v9 = vmul.f32 %v50_v7, %v42_v1 }
  0x1a   :  { %53 = vst [vmem:[#allocation7] sm:$0xff] %v51_v8 }
  0x1b   :  { %54 = vst [vmem:[#allocation7 + $0x8] sm:$0xff] %v52_v9 }
  0x1c   :  { %67 = dma.vmem_to_hbm [thread:$0]  %s60_s21, 256, %s62_s24, [#allocation4], %s149_s18, %s149_s18, %s150_s19  }
  0x1d   :  { %145 = dma.done.wait [#allocation4], 256  }
  0x1e   :  { %146 = vsyncadd [#allocation4], 4294967040 }
  0x1f   :  { %72 = vsyncpa [#allocation3], 1 }
  0x20   :  { %73 = vsyncpa [#allocation4], 1 }
  0x21   :  { %74 = vsyncpa [#allocation5], 1 }

</bundles_post_ra>
